<compile_context>
chip_gen: v7x
topology: tpu7x:2x2x1
jax: 0.10.0
libtpu: 0.0.40
codegen_flags: <defaults>
</compile_context>

<pallas_src>
import functools
import math

import jax
import jax.numpy as jnp
from jax.experimental import pallas as pl
from jax.experimental.pallas import tpu as pltpu


def _round_up(v, m):
    return ((v + m - 1) // m) * m


def _tpu_topology():
    """Best-effort (num TensorCores per chip, VMEM capacity bytes) with safe fallbacks."""
    vmem_cap = 64 << 20          # conservative default (v7x has 64 MiB per TC)
    cores = 1
    try:
        info = pltpu.get_tpu_info()
        vmem_cap = int(getattr(info, "vmem_capacity_bytes", vmem_cap))
    except Exception:
        pass
    try:
        kind = str(jax.devices()[0].device_kind).lower()
        if "v7" in kind or "7x" in kind:
            cores = 2            # v7x: 2 TensorCores per chip
    except Exception:
        pass
    return cores, vmem_cap


def _geoae_kernel(x_ref, w0_ref, b0_ref, wmid_ref, bmid_ref, wlast_ref, blast_ref,
                  out_ref, *, n_mid, dp):
    """Fused encoder+decoder forward for one batch tile.

    x_ref:     [tb, dim]        f32 input tile
    w0_ref:    [dim, P]         bf16, layer-0 weight, out-cols zero-padded
    b0_ref:    [1, P]           f32
    wmid_ref:  [n_mid, P, P]    bf16, zero-padded mid-layer weights (layout [in, out])
    bmid_ref:  [n_mid, 1, P]    f32
    wlast_ref: [P, dim_pad]     bf16, zero-padded last-layer weight
    blast_ref: [1, dim_pad]     f32
    out_ref:   [tb, dim_pad + P]  columns [0:dim_pad] = x_hat (padded),
                                  columns [dim_pad:]  = z (padded bottleneck)

    Zero-padding keeps every padded activation column exactly zero through
    matmul, bias-add and ReLU, so no per-layer slicing is needed and all
    tensors stay lane-dense (128-multiples).
    """
    f32 = jnp.float32
    bf16 = jnp.bfloat16

    x = x_ref[...].astype(bf16)                                       # [tb, dim]

    # Layer 0 (encoder input layer) + ReLU.
    h = jnp.dot(x, w0_ref[...], preferred_element_type=f32) + b0_ref[...]
    h = jnp.maximum(h, 0.0)                                           # [tb, P] f32

    bottleneck = n_mid // 2 - 1                                       # encoder output layer
    z = None
    for mi in range(n_mid):
        h = jnp.dot(h.astype(bf16), wmid_ref[mi],
                    preferred_element_type=f32) + bmid_ref[mi]
        if mi == bottleneck:
            z = h                                                     # linear bottleneck
        else:
            h = jnp.maximum(h, 0.0)

    # Last decoder layer (linear).
    x_hat = jnp.dot(h.astype(bf16), wlast_ref[...],
                    preferred_element_type=f32) + blast_ref[...]      # [tb, dim_pad]

    # Two lane-aligned (128-multiple offset & width) full stores.
    out_ref[:, :dp] = x_hat.astype(out_ref.dtype)
    out_ref[:, dp:] = z.astype(out_ref.dtype)


def init_geoae_params(key, dim, emb_dim, layer_widths=(64, 64, 64), dtype=jnp.float32):
    """PyTorch-Linear-style init: U(-1/sqrt(fan_in), 1/sqrt(fan_in)); W stored [in, out]."""
    enc_dims = [dim] + list(layer_widths) + [emb_dim]
    dec_dims = [emb_dim] + list(layer_widths[::-1]) + [dim]
    params = []
    for fan_in, fan_out in zip(enc_dims[:-1] + dec_dims[:-1],
                               enc_dims[1:] + dec_dims[1:]):
        key, kw, kb = jax.random.split(key, 3)
        bound = 1.0 / math.sqrt(fan_in)
        w = jax.random.uniform(kw, (fan_in, fan_out), dtype, -bound, bound)
        b = jax.random.uniform(kb, (1, fan_out), dtype, -bound, bound)
        params.append((w, b))
    return params  # 8 (w, b) pairs: enc0..enc3, dec0..dec3


def pack_geoae_params(params, compute_dtype=jnp.bfloat16):
    """Pack params once (call at init, not per forward).

    Returns a dict of:
      w_first [dim, P] / b_first [1, P]
      w_mid   [n_mid, P, P] / b_mid [n_mid, 1, P]
      w_last  [P, dim_pad] / b_last [1, dim_pad]
    Weights in `compute_dtype` (bf16), biases in f32. P = 128-rounded max
    inter-layer width; dim is never folded into P.
    """
    n_layers = len(params)
    n_mid = n_layers - 2
    dim = int(params[0][0].shape[0])
    inter_widths = [int(w.shape[1]) for w, _ in params[:-1]]
    p = _round_up(max(inter_widths), 128)
    dp = _round_up(dim, 128)
    f32 = jnp.float32

    w0, b0 = params[0]
    fo0 = int(w0.shape[1])
    w_first = jnp.zeros((dim, p), compute_dtype).at[:, :fo0].set(w0.astype(compute_dtype))
    b_first = jnp.zeros((1, p), f32).at[:, :fo0].set(b0.reshape(1, -1).astype(f32))

    w_mid = jnp.zeros((n_mid, p, p), compute_dtype)
    b_mid = jnp.zeros((n_mid, 1, p), f32)
    for mi, (w, b) in enumerate(params[1:-1]):
        fi, fo = int(w.shape[0]), int(w.shape[1])
        w_mid = w_mid.at[mi, :fi, :fo].set(w.astype(compute_dtype))
        b_mid = b_mid.at[mi, 0, :fo].set(b.reshape(-1).astype(f32))

    wl, bl = params[-1]
    fli, flo = int(wl.shape[0]), int(wl.shape[1])
    w_last = jnp.zeros((p, dp), compute_dtype).at[:fli, :flo].set(wl.astype(compute_dtype))
    b_last = jnp.zeros((1, dp), f32).at[:, :flo].set(bl.reshape(1, -1).astype(f32))

    return {"w_first": w_first, "b_first": b_first,
            "w_mid": w_mid, "b_mid": b_mid,
            "w_last": w_last, "b_last": b_last}


def geoae_forward(x, packed, *, emb_dim, tb=None):
    """Returns (x_hat [B, dim], z [B, emb_dim]) — matches GeoAE.forward."""
    B, D = x.shape
    p = int(packed["w_first"].shape[1])
    dp = int(packed["w_last"].shape[1])
    n_mid = int(packed["w_mid"].shape[0])
    ow = dp + p

    cores, vmem_cap = _tpu_topology()

    # VMEM accounting: double-buffered x/out tiles + live f32 activations per row.
    bytes_per_row = 4 * (2 * D + 2 * ow + 6 * p)
    param_bytes = sum(int(v.size) * v.dtype.itemsize for v in packed.values())
    vmem_budget = min(vmem_cap // 2, 32 << 20) - 2 * param_bytes - (2 << 20)
    vmem_budget = max(vmem_budget, 4 << 20)

    if tb is None:
        tb_cap = max(8, min(4096, (vmem_budget // bytes_per_row) // 8 * 8))
        if cores >= 2:
            # v7x: even grid, >= 2 steps so both TensorCores get balanced work.
            n_steps = max(2, 2 * pl.cdiv(pl.cdiv(B, tb_cap), 2))
        else:
            # v5e/v6e: single TensorCore -> minimize grid steps (pipeline overhead).
            n_steps = max(1, pl.cdiv(B, tb_cap))
        tb = min(tb_cap, _round_up(pl.cdiv(B, n_steps), 8))
    tb = _round_up(max(int(tb), 8), 8)

    B_pad = _round_up(B, tb)
    if B_pad != B:
        x = jnp.pad(x, ((0, B_pad - B), (0, 0)))
    grid = B_pad // tb

    vmem_est = 2 * param_bytes + tb * bytes_per_row + (2 << 20)
    vmem_ceiling = max(8 << 20, min(vmem_cap - (8 << 20), 64 << 20))
    vmem_limit = int(min(max(vmem_est, 8 << 20), vmem_ceiling))

    flops = 2 * B_pad * (D * p + n_mid * p * p + p * dp)
    bytes_accessed = 4 * B_pad * (D + ow) + param_bytes

    kernel = functools.partial(_geoae_kernel, n_mid=n_mid, dp=dp)

    out = pl.pallas_call(
        kernel,
        out_shape=jax.ShapeDtypeStruct((B_pad, ow), jnp.float32),
        grid_spec=pltpu.PrefetchScalarGridSpec(
            num_scalar_prefetch=0,
            grid=(grid,),
            in_specs=[
                pl.BlockSpec((tb, D), lambda i: (i, 0)),                   # x batch tile
                pl.BlockSpec(packed["w_first"].shape, lambda i: (0, 0)),   # resident params
                pl.BlockSpec(packed["b_first"].shape, lambda i: (0, 0)),
                pl.BlockSpec(packed["w_mid"].shape, lambda i: (0, 0, 0)),
                pl.BlockSpec(packed["b_mid"].shape, lambda i: (0, 0, 0)),
                pl.BlockSpec(packed["w_last"].shape, lambda i: (0, 0)),
                pl.BlockSpec(packed["b_last"].shape, lambda i: (0, 0)),
            ],
            out_specs=pl.BlockSpec((tb, ow), lambda i: (i, 0)),
        ),
        compiler_params=pltpu.CompilerParams(
            dimension_semantics=("parallel",),
            vmem_limit_bytes=vmem_limit,
        ),
        cost_estimate=pl.CostEstimate(
            flops=flops, transcendentals=0, bytes_accessed=bytes_accessed),
    )(x, packed["w_first"], packed["b_first"], packed["w_mid"], packed["b_mid"],
      packed["w_last"], packed["b_last"])

    x_hat = out[:B, :D]
    z = out[:B, dp:dp + emb_dim]
    return x_hat, z


def _reference_forward(x, params, compute_dtype=jnp.float32):
    """Pure-JAX reference of the same forward (optionally bf16 matmul operands)."""
    f32 = jnp.float32
    n = len(params)
    half = n // 2
    h = x.astype(f32)
    z = None
    for li, (w, b) in enumerate(params):
        h = jnp.dot(h.astype(compute_dtype), w.astype(compute_dtype),
                    preferred_element_type=f32) + b.reshape(1, -1).astype(f32)
        if li == half - 1:
            z = h                     # linear bottleneck
        elif li != n - 1:
            h = jnp.maximum(h, 0.0)   # hidden layers: ReLU; last layer: linear
    return h, z


# TODO(synk): encoder_loss (pdist-based) and decoder_loss are training-time losses,
# not part of forward(); they are not implemented as kernels here.

if __name__ == "__main__":
    dim, emb_dim = 32, 8
    B = 16

    key = jax.random.PRNGKey(0)
    kx, kp = jax.random.split(key)
    x = jax.random.normal(kx, (B, dim), dtype=jnp.float32)

    params = init_geoae_params(kp, dim, emb_dim)
    packed = pack_geoae_params(params)          # packed once, outside the hot path

    fwd = jax.jit(functools.partial(geoae_forward, emb_dim=emb_dim))
    x_hat, z = fwd(x, packed)
    x_hat, z = jax.block_until_ready((x_hat, z))

    assert x_hat.shape == (B, dim) and z.shape == (B, emb_dim)

    # Tight check vs. a reference using the same bf16 matmul / f32 accumulate precision.
    x_hat_bf, z_bf = _reference_forward(x, params, compute_dtype=jnp.bfloat16)
    assert jnp.allclose(x_hat, x_hat_bf, atol=2e-2, rtol=2e-2)
    assert jnp.allclose(z, z_bf, atol=2e-2, rtol=2e-2)

    # Loose sanity check vs. the full-f32 reference (bf16 matmul noise bounded).
    x_hat_f32, z_f32 = _reference_forward(x, params, compute_dtype=jnp.float32)
    assert jnp.allclose(x_hat, x_hat_f32, atol=1e-1, rtol=1e-1)
    assert jnp.allclose(z, z_f32, atol=1e-1, rtol=1e-1)

    print("KERNEL_OK")
</pallas_src>

<mosaic_0001>
module attributes {stable_mosaic.version = 11 : i64} {
  func.func @_geoae_kernel(%arg0: i32, %arg1: memref<16x32xf32, #tpu.memory_space<vmem>>, %arg2: memref<32x128xbf16, #tpu.memory_space<vmem>>, %arg3: memref<1x128xf32, #tpu.memory_space<vmem>>, %arg4: memref<6x128x128xbf16, #tpu.memory_space<vmem>>, %arg5: memref<6x1x128xf32, #tpu.memory_space<vmem>>, %arg6: memref<128x128xbf16, #tpu.memory_space<vmem>>, %arg7: memref<1x128xf32, #tpu.memory_space<vmem>>, %arg8: memref<16x256xf32, #tpu.memory_space<vmem>>) attributes {dimension_semantics = [#tpu.dimension_semantics<parallel>], iteration_bounds = array<i64: 1>, scalar_prefetch = 0 : i64, scratch_operands = 0 : i64, tpu.core_type = #tpu.core_type<tc>, window_params = [{transform_indices = @transform_0, window_bounds = array<i64: 16, 32>}, {pipeline_mode = #tpu.pipeline_mode<synchronous>, transform_indices = @transform_1, window_bounds = array<i64: 32, 128>}, {pipeline_mode = #tpu.pipeline_mode<synchronous>, transform_indices = @transform_2, window_bounds = array<i64: 1, 128>}, {pipeline_mode = #tpu.pipeline_mode<synchronous>, transform_indices = @transform_3, window_bounds = array<i64: 6, 128, 128>}, {pipeline_mode = #tpu.pipeline_mode<synchronous>, transform_indices = @transform_4, window_bounds = array<i64: 6, 1, 128>}, {pipeline_mode = #tpu.pipeline_mode<synchronous>, transform_indices = @transform_5, window_bounds = array<i64: 128, 128>}, {pipeline_mode = #tpu.pipeline_mode<synchronous>, transform_indices = @transform_6, window_bounds = array<i64: 1, 128>}, {transform_indices = @transform_7, window_bounds = array<i64: 16, 256>}]} {
    %c0 = arith.constant 0 : index
    %c0_0 = arith.constant 0 : index
    %0 = vector.load %arg1[%c0, %c0_0] : memref<16x32xf32, #tpu.memory_space<vmem>>, vector<16x32xf32>
    %1 = arith.truncf %0 : vector<16x32xf32> to vector<16x32xbf16>
    %c0_1 = arith.constant 0 : index
    %c0_2 = arith.constant 0 : index
    %2 = vector.load %arg2[%c0_1, %c0_2] : memref<32x128xbf16, #tpu.memory_space<vmem>>, vector<32x128xbf16>
    %cst = arith.constant dense<0.000000e+00> : vector<16x128xf32>
    %3 = tpu.matmul %1, %2, %cst {dimension_numbers = #tpu.dot_dimension_numbers<[1], [0], [0], [1], [0, 0, 1, 1], [], []>} : vector<16x32xbf16>, vector<32x128xbf16>, vector<16x128xf32> -> vector<16x128xf32>
    %c0_3 = arith.constant 0 : index
    %c0_4 = arith.constant 0 : index
    %4 = vector.load %arg3[%c0_3, %c0_4] : memref<1x128xf32, #tpu.memory_space<vmem>>, vector<1x128xf32>
    %5 = vector.broadcast %4 : vector<1x128xf32> to vector<16x128xf32>
    %6 = arith.addf %3, %5 : vector<16x128xf32>
    %cst_5 = arith.constant 0.000000e+00 : f32
    %7 = vector.broadcast %cst_5 : f32 to vector<16x128xf32>
    %8 = arith.maximumf %6, %7 : vector<16x128xf32>
    %9 = arith.truncf %8 : vector<16x128xf32> to vector<16x128xbf16>
    %c0_6 = arith.constant 0 : index
    %c0_7 = arith.constant 0 : index
    %c0_8 = arith.constant 0 : index
    %10 = vector.load %arg4[%c0_6, %c0_7, %c0_8] : memref<6x128x128xbf16, #tpu.memory_space<vmem>>, vector<1x128x128xbf16>
    %11 = vector.shape_cast %10 : vector<1x128x128xbf16> to vector<128x128xbf16>
    %cst_9 = arith.constant dense<0.000000e+00> : vector<16x128xf32>
    %12 = tpu.matmul %9, %11, %cst_9 {dimension_numbers = #tpu.dot_dimension_numbers<[1], [0], [0], [1], [0, 0, 1, 1], [], []>} : vector<16x128xbf16>, vector<128x128xbf16>, vector<16x128xf32> -> vector<16x128xf32>
    %c0_10 = arith.constant 0 : index
    %c0_11 = arith.constant 0 : index
    %c0_12 = arith.constant 0 : index
    %13 = vector.load %arg5[%c0_10, %c0_11, %c0_12] : memref<6x1x128xf32, #tpu.memory_space<vmem>>, vector<1x1x128xf32>
    %14 = vector.shape_cast %13 : vector<1x1x128xf32> to vector<1x128xf32>
    %15 = vector.broadcast %14 : vector<1x128xf32> to vector<16x128xf32>
    %16 = arith.addf %12, %15 : vector<16x128xf32>
    %cst_13 = arith.constant 0.000000e+00 : f32
    %17 = vector.broadcast %cst_13 : f32 to vector<16x128xf32>
    %18 = arith.maximumf %16, %17 : vector<16x128xf32>
    %19 = arith.truncf %18 : vector<16x128xf32> to vector<16x128xbf16>
    %c1 = arith.constant 1 : index
    %c0_14 = arith.constant 0 : index
    %c0_15 = arith.constant 0 : index
    %20 = vector.load %arg4[%c1, %c0_14, %c0_15] : memref<6x128x128xbf16, #tpu.memory_space<vmem>>, vector<1x128x128xbf16>
    %21 = vector.shape_cast %20 : vector<1x128x128xbf16> to vector<128x128xbf16>
    %cst_16 = arith.constant dense<0.000000e+00> : vector<16x128xf32>
    %22 = tpu.matmul %19, %21, %cst_16 {dimension_numbers = #tpu.dot_dimension_numbers<[1], [0], [0], [1], [0, 0, 1, 1], [], []>} : vector<16x128xbf16>, vector<128x128xbf16>, vector<16x128xf32> -> vector<16x128xf32>
    %c1_17 = arith.constant 1 : index
    %c0_18 = arith.constant 0 : index
    %c0_19 = arith.constant 0 : index
    %23 = vector.load %arg5[%c1_17, %c0_18, %c0_19] : memref<6x1x128xf32, #tpu.memory_space<vmem>>, vector<1x1x128xf32>
    %24 = vector.shape_cast %23 : vector<1x1x128xf32> to vector<1x128xf32>
    %25 = vector.broadcast %24 : vector<1x128xf32> to vector<16x128xf32>
    %26 = arith.addf %22, %25 : vector<16x128xf32>
    %cst_20 = arith.constant 0.000000e+00 : f32
    %27 = vector.broadcast %cst_20 : f32 to vector<16x128xf32>
    %28 = arith.maximumf %26, %27 : vector<16x128xf32>
    %29 = arith.truncf %28 : vector<16x128xf32> to vector<16x128xbf16>
    %c2 = arith.constant 2 : index
    %c0_21 = arith.constant 0 : index
    %c0_22 = arith.constant 0 : index
    %30 = vector.load %arg4[%c2, %c0_21, %c0_22] : memref<6x128x128xbf16, #tpu.memory_space<vmem>>, vector<1x128x128xbf16>
    %31 = vector.shape_cast %30 : vector<1x128x128xbf16> to vector<128x128xbf16>
    %cst_23 = arith.constant dense<0.000000e+00> : vector<16x128xf32>
    %32 = tpu.matmul %29, %31, %cst_23 {dimension_numbers = #tpu.dot_dimension_numbers<[1], [0], [0], [1], [0, 0, 1, 1], [], []>} : vector<16x128xbf16>, vector<128x128xbf16>, vector<16x128xf32> -> vector<16x128xf32>
    %c2_24 = arith.constant 2 : index
    %c0_25 = arith.constant 0 : index
    %c0_26 = arith.constant 0 : index
    %33 = vector.load %arg5[%c2_24, %c0_25, %c0_26] : memref<6x1x128xf32, #tpu.memory_space<vmem>>, vector<1x1x128xf32>
    %34 = vector.shape_cast %33 : vector<1x1x128xf32> to vector<1x128xf32>
    %35 = vector.broadcast %34 : vector<1x128xf32> to vector<16x128xf32>
    %36 = arith.addf %32, %35 : vector<16x128xf32>
    %37 = arith.truncf %36 : vector<16x128xf32> to vector<16x128xbf16>
    %c3 = arith.constant 3 : index
    %c0_27 = arith.constant 0 : index
    %c0_28 = arith.constant 0 : index
    %38 = vector.load %arg4[%c3, %c0_27, %c0_28] : memref<6x128x128xbf16, #tpu.memory_space<vmem>>, vector<1x128x128xbf16>
    %39 = vector.shape_cast %38 : vector<1x128x128xbf16> to vector<128x128xbf16>
    %cst_29 = arith.constant dense<0.000000e+00> : vector<16x128xf32>
    %40 = tpu.matmul %37, %39, %cst_29 {dimension_numbers = #tpu.dot_dimension_numbers<[1], [0], [0], [1], [0, 0, 1, 1], [], []>} : vector<16x128xbf16>, vector<128x128xbf16>, vector<16x128xf32> -> vector<16x128xf32>
    %c3_30 = arith.constant 3 : index
    %c0_31 = arith.constant 0 : index
    %c0_32 = arith.constant 0 : index
    %41 = vector.load %arg5[%c3_30, %c0_31, %c0_32] : memref<6x1x128xf32, #tpu.memory_space<vmem>>, vector<1x1x128xf32>
    %42 = vector.shape_cast %41 : vector<1x1x128xf32> to vector<1x128xf32>
    %43 = vector.broadcast %42 : vector<1x128xf32> to vector<16x128xf32>
    %44 = arith.addf %40, %43 : vector<16x128xf32>
    %cst_33 = arith.constant 0.000000e+00 : f32
    %45 = vector.broadcast %cst_33 : f32 to vector<16x128xf32>
    %46 = arith.maximumf %44, %45 : vector<16x128xf32>
    %47 = arith.truncf %46 : vector<16x128xf32> to vector<16x128xbf16>
    %c4 = arith.constant 4 : index
    %c0_34 = arith.constant 0 : index
    %c0_35 = arith.constant 0 : index
    %48 = vector.load %arg4[%c4, %c0_34, %c0_35] : memref<6x128x128xbf16, #tpu.memory_space<vmem>>, vector<1x128x128xbf16>
    %49 = vector.shape_cast %48 : vector<1x128x128xbf16> to vector<128x128xbf16>
    %cst_36 = arith.constant dense<0.000000e+00> : vector<16x128xf32>
    %50 = tpu.matmul %47, %49, %cst_36 {dimension_numbers = #tpu.dot_dimension_numbers<[1], [0], [0], [1], [0, 0, 1, 1], [], []>} : vector<16x128xbf16>, vector<128x128xbf16>, vector<16x128xf32> -> vector<16x128xf32>
    %c4_37 = arith.constant 4 : index
    %c0_38 = arith.constant 0 : index
    %c0_39 = arith.constant 0 : index
    %51 = vector.load %arg5[%c4_37, %c0_38, %c0_39] : memref<6x1x128xf32, #tpu.memory_space<vmem>>, vector<1x1x128xf32>
    %52 = vector.shape_cast %51 : vector<1x1x128xf32> to vector<1x128xf32>
    %53 = vector.broadcast %52 : vector<1x128xf32> to vector<16x128xf32>
    %54 = arith.addf %50, %53 : vector<16x128xf32>
    %cst_40 = arith.constant 0.000000e+00 : f32
    %55 = vector.broadcast %cst_40 : f32 to vector<16x128xf32>
    %56 = arith.maximumf %54, %55 : vector<16x128xf32>
    %57 = arith.truncf %56 : vector<16x128xf32> to vector<16x128xbf16>
    %c5 = arith.constant 5 : index
    %c0_41 = arith.constant 0 : index
    %c0_42 = arith.constant 0 : index
    %58 = vector.load %arg4[%c5, %c0_41, %c0_42] : memref<6x128x128xbf16, #tpu.memory_space<vmem>>, vector<1x128x128xbf16>
    %59 = vector.shape_cast %58 : vector<1x128x128xbf16> to vector<128x128xbf16>
    %cst_43 = arith.constant dense<0.000000e+00> : vector<16x128xf32>
    %60 = tpu.matmul %57, %59, %cst_43 {dimension_numbers = #tpu.dot_dimension_numbers<[1], [0], [0], [1], [0, 0, 1, 1], [], []>} : vector<16x128xbf16>, vector<128x128xbf16>, vector<16x128xf32> -> vector<16x128xf32>
    %c5_44 = arith.constant 5 : index
    %c0_45 = arith.constant 0 : index
    %c0_46 = arith.constant 0 : index
    %61 = vector.load %arg5[%c5_44, %c0_45, %c0_46] : memref<6x1x128xf32, #tpu.memory_space<vmem>>, vector<1x1x128xf32>
    %62 = vector.shape_cast %61 : vector<1x1x128xf32> to vector<1x128xf32>
    %63 = vector.broadcast %62 : vector<1x128xf32> to vector<16x128xf32>
    %64 = arith.addf %60, %63 : vector<16x128xf32>
    %cst_47 = arith.constant 0.000000e+00 : f32
    %65 = vector.broadcast %cst_47 : f32 to vector<16x128xf32>
    %66 = arith.maximumf %64, %65 : vector<16x128xf32>
    %67 = arith.truncf %66 : vector<16x128xf32> to vector<16x128xbf16>
    %c0_48 = arith.constant 0 : index
    %c0_49 = arith.constant 0 : index
    %68 = vector.load %arg6[%c0_48, %c0_49] : memref<128x128xbf16, #tpu.memory_space<vmem>>, vector<128x128xbf16>
    %cst_50 = arith.constant dense<0.000000e+00> : vector<16x128xf32>
    %69 = tpu.matmul %67, %68, %cst_50 {dimension_numbers = #tpu.dot_dimension_numbers<[1], [0], [0], [1], [0, 0, 1, 1], [], []>} : vector<16x128xbf16>, vector<128x128xbf16>, vector<16x128xf32> -> vector<16x128xf32>
    %c0_51 = arith.constant 0 : index
    %c0_52 = arith.constant 0 : index
    %70 = vector.load %arg7[%c0_51, %c0_52] : memref<1x128xf32, #tpu.memory_space<vmem>>, vector<1x128xf32>
    %71 = vector.broadcast %70 : vector<1x128xf32> to vector<16x128xf32>
    %72 = arith.addf %69, %71 : vector<16x128xf32>
    %c0_53 = arith.constant 0 : index
    %c0_54 = arith.constant 0 : index
    %73 = vector.load %arg8[%c0_53, %c0_54] : memref<16x256xf32, #tpu.memory_space<vmem>>, vector<16x128xf32>
    tpu.vector_store %arg8[%c0_53, %c0_54], %72 {strides = array<i32>} : memref<16x256xf32, #tpu.memory_space<vmem>>, vector<16x128xf32>,
    %c0_55 = arith.constant 0 : index
    %c128 = arith.constant 128 : index
    %74 = vector.load %arg8[%c0_55, %c128] : memref<16x256xf32, #tpu.memory_space<vmem>>, vector<16x128xf32>
    tpu.vector_store %arg8[%c0_55, %c128], %36 {strides = array<i32>} : memref<16x256xf32, #tpu.memory_space<vmem>>, vector<16x128xf32>,
    return
  }
  func.func @transform_0(%arg0: i32) -> (i32, i32) {
    %c0_i32 = arith.constant 0 : i32
    %c0_i32_0 = arith.constant 0 : i32
    return %arg0, %c0_i32 : i32, i32
  }
  func.func @transform_1(%arg0: i32) -> (i32, i32) {
    %c0_i32 = arith.constant 0 : i32
    %c0_i32_0 = arith.constant 0 : i32
    %c0_i32_1 = arith.constant 0 : i32
    return %c0_i32, %c0_i32_0 : i32, i32
  }
  func.func @transform_2(%arg0: i32) -> (i32, i32) {
    %c0_i32 = arith.constant 0 : i32
    %c0_i32_0 = arith.constant 0 : i32
    %c0_i32_1 = arith.constant 0 : i32
    return %c0_i32, %c0_i32_0 : i32, i32
  }
  func.func @transform_3(%arg0: i32) -> (i32, i32, i32) {
    %c0_i32 = arith.constant 0 : i32
    %c0_i32_0 = arith.constant 0 : i32
    %c0_i32_1 = arith.constant 0 : i32
    %c0_i32_2 = arith.constant 0 : i32
    return %c0_i32, %c0_i32_0, %c0_i32_1 : i32, i32, i32
  }
  func.func @transform_4(%arg0: i32) -> (i32, i32, i32) {
    %c0_i32 = arith.constant 0 : i32
    %c0_i32_0 = arith.constant 0 : i32
    %c0_i32_1 = arith.constant 0 : i32
    %c0_i32_2 = arith.constant 0 : i32
    return %c0_i32, %c0_i32_0, %c0_i32_1 : i32, i32, i32
  }
  func.func @transform_5(%arg0: i32) -> (i32, i32) {
    %c0_i32 = arith.constant 0 : i32
    %c0_i32_0 = arith.constant 0 : i32
    %c0_i32_1 = arith.constant 0 : i32
    return %c0_i32, %c0_i32_0 : i32, i32
  }
  func.func @transform_6(%arg0: i32) -> (i32, i32) {
    %c0_i32 = arith.constant 0 : i32
    %c0_i32_0 = arith.constant 0 : i32
    %c0_i32_1 = arith.constant 0 : i32
    return %c0_i32, %c0_i32_0 : i32, i32
  }
  func.func @transform_7(%arg0: i32) -> (i32, i32) {
    %c0_i32 = arith.constant 0 : i32
    %c0_i32_0 = arith.constant 0 : i32
    return %arg0, %c0_i32 : i32, i32
  }
}

</mosaic_0001>

<bundles_post_ra>
// kernel: geoae_forward.1
= control target key start
LH: loop header
LB: loop body
LE: loop exit
PB: predicated region body
PF: predicated region fallthrough
CT: control target
= control target key end

     0   :  { %12 = vsyncpa [#allocation3], 0  ;;  %s1649_s0 = inlined_call_operand.hbm [shape: f32[16,32], index: 0, kind: input, shape index: {}]   ;;  %s1650_s1 = inlined_call_operand.hbm [shape: bf16[32,128], index: 1, kind: input, shape index: {}]   ;;  %s1651_s2 = inlined_call_operand.vmem [shape: f32[1,128], index: 2, kind: input, shape index: {}]   ;;  %s1652_s3 = inlined_call_operand.hbm [shape: bf16[6,128,128], index: 3, kind: input, shape index: {}]   ;;  %s1653_s4 = inlined_call_operand.vmem [shape: f32[6,1,128], index: 4, kind: input, shape index: {}]   ;;  %s1654_s5 = inlined_call_operand.hbm [shape: bf16[128,128], index: 5, kind: input, shape index: {}]   ;;  %s1655_s6 = inlined_call_operand.vmem [shape: f32[1,128], index: 6, kind: input, shape index: {}]   ;;  %s1656_s7 = inlined_call_operand.vmem [shape: f32[16,256], index: 7, kind: output, shape index: {}]  }
   0x1   :  { %13 = vsyncpa [#allocation5], 0 }
   0x2   :  { %14 = vsyncpa [#allocation8], 0  ;;  %s1425_s24 = smov [#allocation4]   ;;  %s1331_s28 = scalar_lea.hbm %s1650_s1, 256 }
   0x3   :  { %s32_s25 = sshll.u32 %s1425_s24, 4  ;;  %p1332_p0 = scmp.ne.s32.totalorder %s1650_s1, %s1331_s28  ;;  %s33_s25 = int_to_ptr.vmem [resolvable:$true] %s32_s25 }
   0x4   :  { %p1335_p1 = scmp.lt.u32.totalorder %s1331_s28, %s1650_s1 }
   0x6   :  { %p1337_p2 = pnand %p1335_p1, %p1332_p0 }
   0x8   :  { %1340 = shalt.err (!%p1337_p2)
}
   0x9   :  { %s1341_s10 = scalar_lea.vmem %s33_s25, 256  ;;  %p1346_p4 = scmp.lt.s32.totalorder %s33_s25, %s33_s25 }
   0xa   :  { %p1342_p3 = scmp.ne.s32.totalorder %s33_s25, %s1341_s10  ;;  %p1347_p5 = scmp.lt.s32.totalorder %s1341_s10, %s1341_s10 }
   0xc   :  { %p1348_p6 = por %p1347_p5, %p1346_p4 }
   0xe   :  { %p1349_p7 = pnand %p1348_p6, %p1342_p3 }
  0x10   :  { %1352 = shalt.err (!%p1349_p7)
}
  0x11   :  { %s1426_s11 = smov 64   ;;  %s1427_s12 = smov 4  }
  0x12   :  { %38 = dma.hbm_to_vmem [thread:$0]  %s1650_s1, 256, %s33_s25, [#allocation5], %s1426_s11, %s1426_s11, %s1427_s12  }
  0x13   :  { %s1428_s15 = smov [#allocation2]   ;;  %s1353_s19 = scalar_lea.hbm %s1649_s0, 256 }
  0x14   :  { %s20_s16 = sshll.u32 %s1428_s15, 4  ;;  %p1354_p8 = scmp.ne.s32.totalorder %s1649_s0, %s1353_s19  ;;  %s21_s16 = int_to_ptr.vmem [resolvable:$true] %s20_s16 }
  0x15   :  { %p1357_p9 = scmp.lt.u32.totalorder %s1353_s19, %s1649_s0 }
  0x17   :  { %p1359_p10 = pnand %p1357_p9, %p1354_p8 }
  0x19   :  { %1362 = shalt.err (!%p1359_p10)
}
  0x1a   :  { %s1363_s24 = scalar_lea.vmem %s21_s16, 256  ;;  %p1368_p12 = scmp.lt.s32.totalorder %s21_s16, %s21_s16 }
  0x1b   :  { %p1364_p11 = scmp.ne.s32.totalorder %s21_s16, %s1363_s24  ;;  %p1369_p13 = scmp.lt.s32.totalorder %s1363_s24, %s1363_s24 }
  0x1d   :  { %p1370_p0 = por %p1369_p13, %p1368_p12 }
  0x1f   :  { %p1371_p1 = pnand %p1370_p0, %p1364_p11 }
  0x21   :  { %1374 = shalt.err (!%p1371_p1)
}
  0x22   :  { %s1429_s1 = smov 128   ;;  %s1430_s25 = smov 8  }
  0x23   :  { %26 = dma.hbm_to_vmem [thread:$0]  %s1649_s0, 256, %s21_s16, [#allocation3], %s1429_s1, %s1429_s1, %s1430_s25  }
  0x24   :  { %s1431_s28 = smov [#allocation6]   ;;  %s1432_s30 = smov [#allocation7]  }
  0x25   :  { %s46_s29 = sshll.u32 %s1431_s28, 4  ;;  %s60_s8 = sshll.u32 %s1432_s30, 4  ;;  %s47_s29 = int_to_ptr.vmem [resolvable:$true] %s46_s29  ;;  %s1502_s8 = int_to_ptr.vmem [resolvable:$true] %s60_s8 }
  0x26   :  { %s1375_s13 = scalar_lea.hbm %s1652_s3, 6144 }
  0x27   :  { %p1376_p2 = scmp.ne.s32.totalorder %s1652_s3, %s1375_s13  ;;  %p1379_p3 = scmp.lt.u32.totalorder %s1375_s13, %s1652_s3 }
  0x29   :  { %p1381_p4 = pnand %p1379_p3, %p1376_p2 }
  0x2b   :  { %1384 = shalt.err (!%p1381_p4)
}
  0x2c   :  { %s1385_s0 = scalar_lea.vmem %s47_s29, 6144  ;;  %p1390_p6 = scmp.lt.s32.totalorder %s47_s29, %s47_s29 }
  0x2d   :  { %p1386_p5 = scmp.ne.s32.totalorder %s47_s29, %s1385_s0  ;;  %p1391_p7 = scmp.lt.s32.totalorder %s1385_s0, %s1385_s0 }
  0x2f   :  { %p1392_p8 = por %p1391_p7, %p1390_p6 }
  0x31   :  { %p1393_p9 = pnand %p1392_p8, %p1386_p5 }
  0x33   :  { %1396 = shalt.err (!%p1393_p9)
}
  0x34   :  { %52 = dma.hbm_to_vmem [thread:$0]  %s1652_s3, 6144, %s47_s29, [#allocation5], %s1426_s11, %s1426_s11, %s1427_s12  }
  0x35   :  { %s1397_s22 = scalar_lea.hbm %s1654_s5, 1024 }
  0x36   :  { %p1398_p10 = scmp.ne.s32.totalorder %s1654_s5, %s1397_s22  ;;  %p1401_p11 = scmp.lt.u32.totalorder %s1397_s22, %s1654_s5 }
  0x38   :  { %p1403_p12 = pnand %p1401_p11, %p1398_p10 }
  0x3a   :  { %1406 = shalt.err (!%p1403_p12)
}
  0x3b   :  { %s1407_s26 = scalar_lea.vmem %s1502_s8, 1024  ;;  %p1412_p0 = scmp.lt.s32.totalorder %s1502_s8, %s1502_s8 }
  0x3c   :  { %p1408_p13 = scmp.ne.s32.totalorder %s1502_s8, %s1407_s26  ;;  %p1413_p1 = scmp.lt.s32.totalorder %s1407_s26, %s1407_s26 }
  0x3e   :  { %p1414_p2 = por %p1413_p1, %p1412_p0 }
  0x40   :  { %p1415_p3 = pnand %p1414_p2, %p1408_p13 }
  0x42   :  { %1418 = shalt.err (!%p1415_p3)
}
  0x43   :  { %66 = dma.hbm_to_vmem [thread:$0]  %s1654_s5, 1024, %s1502_s8, [#allocation8], %s1426_s11, %s1426_s11, %s1427_s12  }
  0x44   :  { %1419 = dma.done.wait [#allocation3], 256  }
  0x45   :  { %1420 = vsyncadd [#allocation3], 4294967040 }
  0x46   :  { %1421 = dma.done.wait [#allocation5], 6400  }
  0x47   :  { %1422 = vsyncadd [#allocation5], 4294960896 }
  0x48   :  { %1423 = dma.done.wait [#allocation8], 1024  }
  0x49   :  { %1424 = vsyncadd [#allocation8], 4294966272  ;;  %v1433_v0 = vmov 0.0   ;;  %vm1434_vm0 = vmmov 0   ;;  %v1273_v1 = vld [vmem:[#allocation4] sm:$0xff]   ;;  %v1274_v2 = vld [vmem:[#allocation4 + $0x8] sm:$0xff]  }
  0x4a   :  { %1115 = vmatprep.subr.bf16.mxu0 %v1433_v0  ;;  %1119 = vmatprep.mubr.msk.bf16.mxu0 %vm1434_vm0, %v1433_v0  ;;  %v82_v3 = vld [vmem:[#allocation2] sm:$0xff]  ;;  %v83_v4 = vld [vmem:[#allocation2 + $0x8] sm:$0xff]  ;;  %vm108_vm1 = vcmask 261120   ;;  %v1277_v8 = vld [vmem:[#allocation6 + $0x10] sm:$0xff]  }
  0x4b   :  { %1123 = vmatprep.subr.bf16.mxu1 %v1433_v0  ;;  %1139 = vmatprep.mubr.msk.bf16.mxu1 %vm1434_vm0, %v1433_v0  ;;  %v1275_v5 = vld [vmem:[#allocation6] sm:$0xff]   ;;  %v84_v6 = vpack.c.bf16 %v83_v4, %v82_v3  ;;  %v1276_v7 = vld [vmem:[#allocation6 + $0x8] sm:$0xff]   ;;  %v1278_v9 = vld [vmem:[#allocation6 + $0x18] sm:$0xff]  }
  0x4c   :  { %1116 = vmatpush3.bf16.msra.mxu0 %v1273_v1  ;;  %1124 = vmatpush3.bf16.msra.mxu1 %v1275_v5  ;;  %v1279_v10 = vld [vmem:[#allocation6 + $0x20] sm:$0xff]   ;;  %v1280_v11 = vld [vmem:[#allocation6 + $0x28] sm:$0xff]   ;;  %v1281_v12 = vld [vmem:[#allocation6 + $0x30] sm:$0xff]  }
  0x4d   :  { %1117 = vmatprep.subr.bf16.mxu0 %v1433_v0  ;;  %1125 = vmatprep.subr.bf16.mxu1 %v1433_v0  ;;  %v1282_v13 = vld [vmem:[#allocation6 + $0x38] sm:$0xff]   ;;  %v1283_v14 = vld [vmem:[#allocation6 + $0x40] sm:$0xff]   ;;  %v1284_v15 = vld [vmem:[#allocation6 + $0x48] sm:$0xff]  }
  0x4e   :  { %v1285_v16 = vld [vmem:[#allocation6 + $0x50] sm:$0xff]   ;;  %v1286_v17 = vld [vmem:[#allocation6 + $0x58] sm:$0xff]   ;;  %v1287_v18 = vld [vmem:[#allocation6 + $0x60] sm:$0xff]  }
  0x4f   :  { %v1288_v19 = vld [vmem:[#allocation6 + $0x68] sm:$0xff]   ;;  %v977_v20 = vld [vmem:[%s1651_s2] ss:$0 sm:$0xff]  ;;  %v1289_v30 = vld [vmem:[#allocation6 + $0x70] sm:$0xff]  }
  0x50   :  { %1118 = vmatpush3.bf16.msra.mxu0 %v1274_v2  ;;  %1126 = vmatpush3.bf16.msra.mxu1 %v1276_v7  ;;  %v1290_v31 = vld [vmem:[#allocation6 + $0x78] sm:$0xff]   ;;  %v1291_v32 = vld [vmem:[#allocation6 + $0x80] sm:$0xff]   ;;  %v1292_v33 = vld [vmem:[#allocation6 + $0x88] sm:$0xff]  }
  0x51   :  { %1143 = vmatprep.subr.bf16.mxu0 %v1433_v0  ;;  %1127 = vmatprep.subr.bf16.mxu1 %v1433_v0  ;;  %v1293_v34 = vld [vmem:[#allocation6 + $0x90] sm:$0xff]   ;;  %v1294_v35 = vld [vmem:[#allocation6 + $0x98] sm:$0xff]   ;;  %v1295_v36 = vld [vmem:[#allocation6 + $0xa0] sm:$0xff]  }
  0x52   :  { %v1296_v37 = vld [vmem:[#allocation6 + $0xa8] sm:$0xff]   ;;  %v981_v38 = vld [vmem:[%s1653_s4] ss:$0 sm:$0xff]  ;;  %v1297_v48 = vld [vmem:[#allocation6 + $0xb0] sm:$0xff]  }
  0x53   :  { %1120 = vmatmul.mubr.msk.bf16.vlgmr.msra.gmra.mrb[0].mxu0 %vm108_vm1, %v84_v6  ;;  %v1298_v49 = vld [vmem:[#allocation6 + $0xb8] sm:$0xff]   ;;  %v1299_v50 = vld [vmem:[#allocation6 + $0xc0] sm:$0xff]   ;;  %v1300_v51 = vld [vmem:[#allocation6 + $0xc8] sm:$0xff]  }
  0x54   :  { %1159 = vmatprep.mubr.msk.bf16.mxu0 %vm1434_vm0, %v1433_v0  ;;  %1128 = vmatpush3.bf16.msra.mxu1 %v1277_v8  ;;  %v1301_v52 = vld [vmem:[#allocation6 + $0xd0] sm:$0xff]   ;;  %v1302_v53 = vld [vmem:[#allocation6 + $0xd8] sm:$0xff]   ;;  %v1303_v54 = vld [vmem:[#allocation6 + $0xe0] sm:$0xff]  }
  0x55   :  { %1129 = vmatprep.subr.bf16.mxu1 %v1433_v0  ;;  %1144 = vmatpush3.bf16.msra.mxu0 %v1283_v14  ;;  %v1304_v55 = vld [vmem:[#allocation6 + $0xe8] sm:$0xff]   ;;  %v991_v56 = vld [vmem:[%s1653_s4 + $0x1] ss:$0 sm:$0xff]  ;;  %v1305_v3 = vld [vmem:[#allocation6 + $0xf0] sm:$0xff]  }
  0x56   :  { %1145 = vmatprep.subr.bf16.mxu0 %v1433_v0  ;;  %v1306_v4 = vld [vmem:[#allocation6 + $0xf8] sm:$0xff]   ;;  %v1307_v5 = vld [vmem:[#allocation6 + $0x100] sm:$0xff]   ;;  %v1308_v6 = vld [vmem:[#allocation6 + $0x108] sm:$0xff]  }
  0x57   :  { %v1309_v7 = vld [vmem:[#allocation6 + $0x110] sm:$0xff]   ;;  %v1310_v8 = vld [vmem:[#allocation6 + $0x118] sm:$0xff]  }
  0x58   :  { %1130 = vmatpush3.bf16.msra.mxu1 %v1278_v9  ;;  %v1311_v9 = vld [vmem:[#allocation6 + $0x120] sm:$0xff]  }
  0x59   :  { %1131 = vmatprep.subr.bf16.mxu1 %v1433_v0  ;;  %1146 = vmatpush3.bf16.msra.mxu0 %v1284_v15 }
  0x5a   :  { %1147 = vmatprep.subr.bf16.mxu0 %v1433_v0 }
  0x5c   :  { %1132 = vmatpush3.bf16.msra.mxu1 %v1279_v10  ;;  %v1312_v10 = vld [vmem:[#allocation6 + $0x128] sm:$0xff]  }
  0x5d   :  { %1133 = vmatprep.subr.bf16.mxu1 %v1433_v0  ;;  %1148 = vmatpush3.bf16.msra.mxu0 %v1285_v16 }
  0x5e   :  { %1149 = vmatprep.subr.bf16.mxu0 %v1433_v0 }
  0x60   :  { %1134 = vmatpush3.bf16.msra.mxu1 %v1280_v11  ;;  %v1001_v11 = vld [vmem:[%s1653_s4 + $0x2] ss:$0 sm:$0xff] }
  0x61   :  { %1135 = vmatprep.subr.bf16.mxu1 %v1433_v0  ;;  %1150 = vmatpush3.bf16.msra.mxu0 %v1286_v17 }
  0x62   :  { %1151 = vmatprep.subr.bf16.mxu0 %v1433_v0 }
  0x64   :  { %1136 = vmatpush3.bf16.msra.mxu1 %v1281_v12 }
  0x65   :  { %1137 = vmatprep.subr.bf16.mxu1 %v1433_v0  ;;  %1152 = vmatpush3.bf16.msra.mxu0 %v1287_v18 }
  0x66   :  { %1153 = vmatprep.subr.bf16.mxu0 %v1433_v0 }
  0x68   :  { %1138 = vmatpush3.bf16.msra.mxu1 %v1282_v13 }
  0x69   :  { %1163 = vmatprep.subr.bf16.mxu1 %v1433_v0  ;;  %1154 = vmatpush3.bf16.msra.mxu0 %v1288_v19  ;;  %v1313_v19 = vld [vmem:[#allocation6 + $0x130] sm:$0xff]  }
  0x6a   :  { %1155 = vmatprep.subr.bf16.mxu0 %v1433_v0 }
  0x6d   :  { %1156 = vmatpush3.bf16.msra.mxu0 %v1289_v30 }
  0x6e   :  { %1157 = vmatprep.subr.bf16.mxu0 %v1433_v0 }
  0x71   :  { %1158 = vmatpush3.bf16.msra.mxu0 %v1290_v31 }
  0x72   :  { %1183 = vmatprep.subr.bf16.mxu0 %v1433_v0 }
 0x126   :  { %v146_v21 = vpop.f32.mrb[0].mxu0 }
 0x127   :  { %v147_v22 = vadd.f32 %v977_v20, %v146_v21  ;;  %v1121_v23 = vpop.f32.mrb[1].mxu0  ;;  %v1315_v21 = vld [vmem:[#allocation6 + $0x140] sm:$0xff]  }
 0x128   :  { %v149_v24 = vpop.f32.mrb[2].mxu0  ;;  %v1317_v23 = vld [vmem:[#allocation6 + $0x150] sm:$0xff]  }
 0x129   :  { %v150_v25 = vadd.f32 %v977_v20, %v149_v24  ;;  %v1122_v26 = vpop.f32.mrb[3].mxu0  ;;  %v153_v27 = vmax.f32 %v147_v22, 0.0  ;;  %v1314_v20 = vld [vmem:[#allocation6 + $0x138] sm:$0xff]   ;;  %v1316_v22 = vld [vmem:[#allocation6 + $0x148] sm:$0xff]  }
 0x12a   :  { %v1318_v24 = vld [vmem:[#allocation6 + $0x158] sm:$0xff]   ;;  %v1320_v26 = vld [vmem:[#allocation6 + $0x168] sm:$0xff]  }
 0x12b   :  { %v154_v28 = vmax.f32 %v150_v25, 0.0  ;;  %v1319_v25 = vld [vmem:[#allocation6 + $0x160] sm:$0xff]  }
 0x12d   :  { %v155_v29 = vpack.c.bf16 %v154_v28, %v153_v27  ;;  %v1011_v27 = vld [vmem:[%s1653_s4 + $0x3] ss:$0 sm:$0xff] }
 0x12f   :  { %1140 = vmatmul.mubr.bf16.vlgmr.msra.gmra.mrb[0].mxu1 %v155_v29 }
 0x130   :  { %1179 = vmatprep.mubr.msk.bf16.mxu1 %vm1434_vm0, %v1433_v0  ;;  %1164 = vmatpush3.bf16.msra.mxu1 %v1291_v32 }
 0x131   :  { %1165 = vmatprep.subr.bf16.mxu1 %v1433_v0 }
 0x134   :  { %1166 = vmatpush3.bf16.msra.mxu1 %v1292_v33 }
 0x135   :  { %1167 = vmatprep.subr.bf16.mxu1 %v1433_v0 }
 0x138   :  { %1168 = vmatpush3.bf16.msra.mxu1 %v1293_v34 }
 0x139   :  { %1169 = vmatprep.subr.bf16.mxu1 %v1433_v0 }
 0x13c   :  { %1170 = vmatpush3.bf16.msra.mxu1 %v1294_v35 }
 0x13d   :  { %1171 = vmatprep.subr.bf16.mxu1 %v1433_v0 }
 0x140   :  { %1172 = vmatpush3.bf16.msra.mxu1 %v1295_v36 }
 0x141   :  { %1173 = vmatprep.subr.bf16.mxu1 %v1433_v0 }
 0x144   :  { %1174 = vmatpush3.bf16.msra.mxu1 %v1296_v37  ;;  %v1321_v37 = vld [vmem:[#allocation6 + $0x170] sm:$0xff]  }
 0x145   :  { %1175 = vmatprep.subr.bf16.mxu1 %v1433_v0 }
 0x148   :  { %1176 = vmatpush3.bf16.msra.mxu1 %v1297_v48 }
 0x149   :  { %1177 = vmatprep.subr.bf16.mxu1 %v1433_v0 }
 0x14c   :  { %1178 = vmatpush3.bf16.msra.mxu1 %v1298_v49 }
 0x14d   :  { %1203 = vmatprep.subr.bf16.mxu1 %v1433_v0 }
 0x202   :  { %v261_v39 = vpop.f32.mrb[0].mxu1 }
 0x203   :  { %v262_v40 = vadd.f32 %v981_v38, %v261_v39  ;;  %v1141_v41 = vpop.f32.mrb[1].mxu1  ;;  %v1323_v39 = vld [vmem:[#allocation7] sm:$0xff]  }
 0x204   :  { %v264_v42 = vpop.f32.mrb[2].mxu1  ;;  %v1325_v41 = vld [vmem:[#allocation7 + $0x10] sm:$0xff]  }
 0x205   :  { %v265_v43 = vadd.f32 %v981_v38, %v264_v42  ;;  %v1142_v44 = vpop.f32.mrb[3].mxu1  ;;  %v268_v45 = vmax.f32 %v262_v40, 0.0  ;;  %v1322_v38 = vld [vmem:[#allocation6 + $0x178] sm:$0xff]   ;;  %v1324_v40 = vld [vmem:[#allocation7 + $0x8] sm:$0xff]  }
 0x206   :  { %v1326_v42 = vld [vmem:[#allocation7 + $0x18] sm:$0xff]   ;;  %v1328_v44 = vld [vmem:[#allocation7 + $0x28] sm:$0xff]  }
 0x207   :  { %v269_v46 = vmax.f32 %v265_v43, 0.0  ;;  %v1327_v43 = vld [vmem:[#allocation7 + $0x20] sm:$0xff]  }
 0x209   :  { %v270_v47 = vpack.c.bf16 %v269_v46, %v268_v45  ;;  %v1021_v45 = vld [vmem:[%s1653_s4 + $0x4] ss:$0 sm:$0xff] }
 0x20b   :  { %1160 = vmatmul.mubr.bf16.vlgmr.msra.gmra.mrb[4].mxu0 %v270_v47 }
 0x20c   :  { %1199 = vmatprep.mubr.msk.bf16.mxu0 %vm1434_vm0, %v1433_v0  ;;  %1184 = vmatpush3.bf16.msra.mxu0 %v1299_v50 }
 0x20d   :  { %1185 = vmatprep.subr.bf16.mxu0 %v1433_v0 }
 0x210   :  { %1186 = vmatpush3.bf16.msra.mxu0 %v1300_v51 }
 0x211   :  { %1187 = vmatprep.subr.bf16.mxu0 %v1433_v0 }
 0x214   :  { %1188 = vmatpush3.bf16.msra.mxu0 %v1301_v52 }
 0x215   :  { %1189 = vmatprep.subr.bf16.mxu0 %v1433_v0 }
 0x218   :  { %1190 = vmatpush3.bf16.msra.mxu0 %v1302_v53 }
 0x219   :  { %1191 = vmatprep.subr.bf16.mxu0 %v1433_v0 }
 0x21c   :  { %1192 = vmatpush3.bf16.msra.mxu0 %v1303_v54 }
 0x21d   :  { %1193 = vmatprep.subr.bf16.mxu0 %v1433_v0 }
 0x220   :  { %1194 = vmatpush3.bf16.msra.mxu0 %v1304_v55  ;;  %v1329_v55 = vld [vmem:[#allocation7 + $0x30] sm:$0xff]  }
 0x221   :  { %1195 = vmatprep.subr.bf16.mxu0 %v1433_v0 }
 0x224   :  { %1196 = vmatpush3.bf16.msra.mxu0 %v1305_v3 }
 0x225   :  { %1197 = vmatprep.subr.bf16.mxu0 %v1433_v0 }
 0x228   :  { %1198 = vmatpush3.bf16.msra.mxu0 %v1306_v4 }
 0x229   :  { %1223 = vmatprep.subr.bf16.mxu0 %v1433_v0 }
 0x2de   :  { %v378_v57 = vpop.f32.mrb[4].mxu0 }
 0x2df   :  { %v379_v58 = vadd.f32 %v991_v56, %v378_v57  ;;  %v1161_v59 = vpop.f32.mrb[5].mxu0  ;;  %v1031_v57 = vld [vmem:[%s1653_s4 + $0x5] ss:$0 sm:$0xff] }
 0x2e0   :  { %v381_v60 = vpop.f32.mrb[6].mxu0 }
 0x2e1   :  { %v382_v61 = vadd.f32 %v991_v56, %v381_v60  ;;  %v1162_v62 = vpop.f32.mrb[7].mxu0  ;;  %v385_v63 = vmax.f32 %v379_v58, 0.0  ;;  %v1330_v56 = vld [vmem:[#allocation7 + $0x38] sm:$0xff]  }
 0x2e3   :  { %v386_v1 = vmax.f32 %v382_v61, 0.0 }
 0x2e5   :  { %v387_v2 = vpack.c.bf16 %v386_v1, %v385_v63 }
 0x2e7   :  { %1180 = vmatmul.mubr.bf16.vlgmr.msra.gmra.mrb[4].mxu1 %v387_v2 }
 0x2e8   :  { %1219 = vmatprep.mubr.msk.bf16.mxu1 %vm1434_vm0, %v1433_v0  ;;  %1204 = vmatpush3.bf16.msra.mxu1 %v1307_v5 }
 0x2e9   :  { %1205 = vmatprep.subr.bf16.mxu1 %v1433_v0 }
 0x2ec   :  { %1206 = vmatpush3.bf16.msra.mxu1 %v1308_v6 }
 0x2ed   :  { %1207 = vmatprep.subr.bf16.mxu1 %v1433_v0 }
 0x2f0   :  { %1208 = vmatpush3.bf16.msra.mxu1 %v1309_v7 }
 0x2f1   :  { %1209 = vmatprep.subr.bf16.mxu1 %v1433_v0 }
 0x2f4   :  { %1210 = vmatpush3.bf16.msra.mxu1 %v1310_v8 }
 0x2f5   :  { %1211 = vmatprep.subr.bf16.mxu1 %v1433_v0 }
 0x2f8   :  { %1212 = vmatpush3.bf16.msra.mxu1 %v1311_v9 }
 0x2f9   :  { %1213 = vmatprep.subr.bf16.mxu1 %v1433_v0 }
 0x2fc   :  { %1214 = vmatpush3.bf16.msra.mxu1 %v1312_v10 }
 0x2fd   :  { %1215 = vmatprep.subr.bf16.mxu1 %v1433_v0 }
 0x300   :  { %1216 = vmatpush3.bf16.msra.mxu1 %v1313_v19 }
 0x301   :  { %1217 = vmatprep.subr.bf16.mxu1 %v1433_v0 }
 0x304   :  { %1218 = vmatpush3.bf16.msra.mxu1 %v1314_v20 }
 0x305   :  { %1243 = vmatprep.subr.bf16.mxu1 %v1433_v0 }
 0x3ba   :  { %v495_v12 = vpop.f32.mrb[4].mxu1 }
 0x3bb   :  { %v496_v13 = vadd.f32 %v1001_v11, %v495_v12  ;;  %v1181_v14 = vpop.f32.mrb[5].mxu1 }
 0x3bc   :  { %v498_v15 = vpop.f32.mrb[6].mxu1 }
 0x3bd   :  { %968 = vst [vmem:[%s1656_s7 + $0x8] sm:$0xff] %v496_v13  ;;  %v499_v16 = vadd.f32 %v1001_v11, %v498_v15  ;;  %v1182_v17 = vpop.f32.mrb[7].mxu1 }
 0x3bf   :  { %v502_v18 = vpack.c.bf16 %v499_v16, %v496_v13  ;;  %969 = vst [vmem:[%s1656_s7 + $0x18] sm:$0xff] %v499_v16 }
 0x3c1   :  { %1200 = vmatmul.mubr.bf16.vlgmr.msra.gmra.mrb[8].mxu0 %v502_v18 }
 0x3c2   :  { %1239 = vmatprep.mubr.msk.bf16.mxu0 %vm1434_vm0, %v1433_v0  ;;  %1224 = vmatpush3.bf16.msra.mxu0 %v1315_v21 }
 0x3c3   :  { %1225 = vmatprep.subr.bf16.mxu0 %v1433_v0 }
 0x3c6   :  { %1226 = vmatpush3.bf16.msra.mxu0 %v1316_v22 }
 0x3c7   :  { %1227 = vmatprep.subr.bf16.mxu0 %v1433_v0 }
 0x3ca   :  { %1228 = vmatpush3.bf16.msra.mxu0 %v1317_v23 }
 0x3cb   :  { %1229 = vmatprep.subr.bf16.mxu0 %v1433_v0 }
 0x3ce   :  { %1230 = vmatpush3.bf16.msra.mxu0 %v1318_v24 }
 0x3cf   :  { %1231 = vmatprep.subr.bf16.mxu0 %v1433_v0 }
 0x3d2   :  { %1232 = vmatpush3.bf16.msra.mxu0 %v1319_v25 }
 0x3d3   :  { %1233 = vmatprep.subr.bf16.mxu0 %v1433_v0 }
 0x3d6   :  { %1234 = vmatpush3.bf16.msra.mxu0 %v1320_v26 }
 0x3d7   :  { %1235 = vmatprep.subr.bf16.mxu0 %v1433_v0 }
 0x3da   :  { %1236 = vmatpush3.bf16.msra.mxu0 %v1321_v37 }
 0x3db   :  { %1237 = vmatprep.subr.bf16.mxu0 %v1433_v0 }
 0x3de   :  { %1238 = vmatpush3.bf16.msra.mxu0 %v1322_v38 }
 0x494   :  { %v610_v28 = vpop.f32.mrb[8].mxu0 }
 0x495   :  { %v611_v29 = vadd.f32 %v1011_v27, %v610_v28  ;;  %v1201_v30 = vpop.f32.mrb[9].mxu0 }
 0x496   :  { %v613_v31 = vpop.f32.mrb[10].mxu0 }
 0x497   :  { %v614_v32 = vadd.f32 %v1011_v27, %v613_v31  ;;  %v1202_v33 = vpop.f32.mrb[11].mxu0  ;;  %v617_v34 = vmax.f32 %v611_v29, 0.0 }
 0x499   :  { %v618_v35 = vmax.f32 %v614_v32, 0.0 }
 0x49b   :  { %v619_v36 = vpack.c.bf16 %v618_v35, %v617_v34 }
 0x49d   :  { %1220 = vmatmul.mubr.bf16.vlgmr.msra.gmra.mrb[8].mxu1 %v619_v36 }
 0x49e   :  { %1259 = vmatprep.mubr.msk.bf16.mxu1 %vm1434_vm0, %v1433_v0  ;;  %1244 = vmatpush3.bf16.msra.mxu1 %v1323_v39 }
 0x49f   :  { %1245 = vmatprep.subr.bf16.mxu1 %v1433_v0 }
 0x4a2   :  { %1246 = vmatpush3.bf16.msra.mxu1 %v1324_v40 }
 0x4a3   :  { %1247 = vmatprep.subr.bf16.mxu1 %v1433_v0 }
 0x4a6   :  { %1248 = vmatpush3.bf16.msra.mxu1 %v1325_v41 }
 0x4a7   :  { %1249 = vmatprep.subr.bf16.mxu1 %v1433_v0 }
 0x4aa   :  { %1250 = vmatpush3.bf16.msra.mxu1 %v1326_v42 }
 0x4ab   :  { %1251 = vmatprep.subr.bf16.mxu1 %v1433_v0 }
 0x4ae   :  { %1252 = vmatpush3.bf16.msra.mxu1 %v1327_v43 }
 0x4af   :  { %1253 = vmatprep.subr.bf16.mxu1 %v1433_v0 }
 0x4b2   :  { %1254 = vmatpush3.bf16.msra.mxu1 %v1328_v44 }
 0x4b3   :  { %1255 = vmatprep.subr.bf16.mxu1 %v1433_v0 }
 0x4b6   :  { %1256 = vmatpush3.bf16.msra.mxu1 %v1329_v55 }
 0x4b7   :  { %1257 = vmatprep.subr.bf16.mxu1 %v1433_v0  ;;  %v1040_v0 = vld [vmem:[%s1655_s6] ss:$0 sm:$0xff] }
 0x4ba   :  { %1258 = vmatpush3.bf16.msra.mxu1 %v1330_v56 }
 0x570   :  { %v727_v46 = vpop.f32.mrb[8].mxu1 }
 0x571   :  { %v728_v47 = vadd.f32 %v1021_v45, %v727_v46  ;;  %v1221_v48 = vpop.f32.mrb[9].mxu1 }
 0x572   :  { %v730_v49 = vpop.f32.mrb[10].mxu1 }
 0x573   :  { %v731_v50 = vadd.f32 %v1021_v45, %v730_v49  ;;  %v1222_v51 = vpop.f32.mrb[11].mxu1  ;;  %v734_v52 = vmax.f32 %v728_v47, 0.0 }
 0x575   :  { %v735_v53 = vmax.f32 %v731_v50, 0.0 }
 0x577   :  { %v736_v54 = vpack.c.bf16 %v735_v53, %v734_v52 }
 0x579   :  { %1240 = vmatmul.mubr.bf16.vlgmr.msra.gmra.mrb[12].mxu0 %v736_v54 }
 0x64c   :  { %v844_v58 = vpop.f32.mrb[12].mxu0 }
 0x64d   :  { %v845_v59 = vadd.f32 %v1031_v57, %v844_v58  ;;  %v1241_v60 = vpop.f32.mrb[13].mxu0 }
 0x64e   :  { %v847_v61 = vpop.f32.mrb[14].mxu0 }
 0x64f   :  { %v848_v62 = vadd.f32 %v1031_v57, %v847_v61  ;;  %v1242_v63 = vpop.f32.mrb[15].mxu0  ;;  %v851_v1 = vmax.f32 %v845_v59, 0.0 }
 0x651   :  { %v852_v2 = vmax.f32 %v848_v62, 0.0 }
 0x653   :  { %v853_v3 = vpack.c.bf16 %v852_v2, %v851_v1 }
 0x655   :  { %1260 = vmatmul.mubr.bf16.vlgmr.msra.gmra.mrb[12].mxu1 %v853_v3 }
 0x728   :  { %v959_v4 = vpop.f32.mrb[12].mxu1 }
 0x729   :  { %v960_v5 = vadd.f32 %v1040_v0, %v959_v4  ;;  %v1261_v6 = vpop.f32.mrb[13].mxu1 }
 0x72a   :  { %v962_v7 = vpop.f32.mrb[14].mxu1 }
 0x72b   :  { %966 = vst [vmem:[%s1656_s7] sm:$0xff] %v960_v5  ;;  %v963_v8 = vadd.f32 %v1040_v0, %v962_v7  ;;  %v1262_v9 = vpop.f32.mrb[15].mxu1 }
 0x72d   :  { %967 = vst [vmem:[%s1656_s7 + $0x10] sm:$0xff] %v963_v8 }
 0x72e   :  { %974 = vsyncpa [#allocation3], 1 }
 0x72f   :  { %975 = vsyncpa [#allocation5], 1 }
 0x730   :  { %976 = vsyncpa [#allocation8], 1 }

</bundles_post_ra>
